<compile_context>
chip_gen: v6e
topology: v6e:2x2x1
jax: 0.10.0
libtpu: 0.0.40
codegen_flags: <defaults>
</compile_context>

<pallas_src>
import functools

import jax
import jax.numpy as jnp
from jax.experimental import pallas as pl
from jax.experimental.pallas import tpu as pltpu


# Which original 3x3 kernel rows/cols (ky/kx in {0,1,2}) collapse onto each of
# the two source-pixel offsets used by an output row/col of parity p (py/px in
# {0,1}).  For parity p, tap t in {0,1} corresponds to source offset p - 1 + t.
_FOLD_SETS = {(0, 0): (0,), (0, 1): (1, 2), (1, 0): (0, 1), (1, 1): (2,)}

_MIB = 1024 * 1024


def _round_up(x, m):
    return (x + m - 1) // m * m


def _vmem_capacity_bytes():
    """Physical VMEM of the current chip (v5e/v6e: 128 MiB, v7x: 64 MiB)."""
    try:
        return int(pltpu.get_tpu_info().vmem_capacity_bytes)
    except Exception:
        return 64 * _MIB  # conservative (v7x-sized) fallback


def _fold_upsample_into_weights(weight_oihw, cout_pad):
    """Fold the nearest-2x upsample into the 3x3 conv weights.

    Returns (9*Cin, 4*cout_pad) where
      row:  t*Cin + ci,  t = (oy+1)*3 + (ox+1),  oy/ox in {-1, 0, +1}
      col:  (py*2 + px)*cout_pad + co,  py/px = output sub-pixel parity
    so that  out[2i+py, 2j+px, co] = bias[co] +
        sum_{oy,ox,ci} x[i+oy, j+ox, ci] * W_fold[t*Cin+ci, (py*2+px)*cout_pad+co]
    which equals Upsample(nearest, 2) followed by Conv2d(k=3, s=1, p=1)
    (PyTorch semantics).  Channels >= Cout are zero padding (lane density).
    """
    Cout, Cin, _, _ = weight_oihw.shape
    w = jnp.transpose(weight_oihw, (2, 3, 1, 0))            # (ky, kx, Cin, Cout)
    w_fold = jnp.zeros((3, 3, Cin, 2, 2, cout_pad), w.dtype)
    for py in range(2):
        for px in range(2):
            for ty in range(2):
                for tx in range(2):
                    oy, ox = py - 1 + ty, px - 1 + tx
                    w_eff = sum(w[ky, kx]
                                for ky in _FOLD_SETS[(py, ty)]
                                for kx in _FOLD_SETS[(px, tx)])
                    w_fold = w_fold.at[oy + 1, ox + 1, :, py, px, :Cout].set(w_eff)
    return w_fold.reshape(9 * Cin, 4 * cout_pad)


def _pick_band_rows(H, per_row_bytes, budget):
    """Largest multiple-of-8 divisor of H whose band working set fits `budget`.

    Prefers >= 2 bands so the spatial grid axis can be split across TensorCores
    even at batch 1; falls back to the whole image if nothing fits.
    """
    best = None
    for bh in range(8, H, 8):
        if H % bh == 0 and bh * per_row_bytes <= budget:
            best = bh
    return best if best is not None else H


def _upsample_conv3x3_kernel(x_ref, w_ref, b_ref, o_ref):
    """One row band of the parity-folded upsample+conv.

    x_ref: (1, H+2, W+2, Cin)   original-resolution image, zero-padded by 1
                                (constant block index along the band axis, so
                                it is DMA'd once per image and VMEM-resident)
    w_ref: (9*Cin, CP)          folded weights, CP = 4*Cout_pad (lane-dense)
    b_ref: (1, CP)              bias replicated over the 4 output parities
    o_ref: (1, BH*W, CP)        parity-packed output rows for this band
    """
    _, _, Wp, Cin = x_ref.shape
    _, M, _ = o_ref.shape
    W = Wp - 2
    BH = M // W
    row0 = pl.multiple_of(pl.program_id(1) * BH, BH)

    # im2col slab: the 9 source-offset taps concatenated along the contraction
    # dim, so the whole band is ONE (BH*W, 9*Cin) x (9*Cin, CP) MXU matmul with
    # a single f32 accumulator write (instead of 9 small-K dots + 9 acc RMWs).
    taps = []
    for dy in range(3):
        for dx in range(3):
            taps.append(
                x_ref[0, pl.ds(row0 + dy, BH), dx:dx + W, :].reshape(M, Cin))
    col = jnp.concatenate(taps, axis=1)                       # (M, 9*Cin)
    acc = jnp.dot(col, w_ref[...], preferred_element_type=jnp.float32)
    o_ref[0] = (acc + b_ref[...].astype(jnp.float32)).astype(o_ref.dtype)


def _upsample_conv_flat(x_nhwc, weight_oihw, bias, compute_dtype, band_rows):
    """Returns the parity-packed output (N, H*W, 4*Cout_pad)."""
    N, H, W, Cin = x_nhwc.shape
    Cout = weight_oihw.shape[0]
    out_dtype = x_nhwc.dtype

    # Lane-dense output: pad Cout so 4*Cout_pad is a multiple of 128.
    cout_pad = _round_up(Cout, 32)
    CP = 4 * cout_pad

    w_fold = _fold_upsample_into_weights(weight_oihw, cout_pad)  # (9*Cin, CP)
    bias_pad = jnp.zeros((cout_pad,), jnp.float32).at[:Cout].set(
        bias.astype(jnp.float32))
    bias4 = jnp.tile(bias_pad, 4).reshape(1, CP)

    # Only the ORIGINAL-resolution image is padded by 1 (the upsample itself is
    # folded into the weights — no upsampled tensor exists anywhere).
    x_pad = jnp.pad(x_nhwc, ((0, 0), (1, 1), (1, 1), (0, 0)))
    if compute_dtype is not None:      # e.g. jnp.bfloat16 for the v5e/v6e/v7x MXU
        x_pad = x_pad.astype(compute_dtype)
        w_fold = w_fold.astype(compute_dtype)
    c_isz = jnp.dtype(x_pad.dtype).itemsize
    o_isz = jnp.dtype(out_dtype).itemsize

    # Generation-aware banding: bigger bands on 128 MiB-VMEM chips (v5e/v6e) to
    # amortize per-grid-step overhead; smaller on v7x (64 MiB physical VMEM).
    cap = _vmem_capacity_bytes()
    band_budget = 16 * _MIB if cap >= 96 * _MIB else 5 * _MIB
    # Per output row: double-buffered out band + im2col slab + f32 acc headroom.
    per_row = W * (2 * CP * o_isz + _round_up(9 * Cin, 128) * c_isz + 4 * CP)
    if band_rows is not None and H % band_rows == 0:
        BH = band_rows
    else:
        BH = _pick_band_rows(H, per_row, band_budget)
    n_bands = H // BH

    # Scoped-VMEM budget: resident padded image (x2 pipeline buffers) + band
    # working set + folded weights, clamped below the chip's physical VMEM.
    img_bytes = (H + 2) * _round_up(W + 2, 8) * _round_up(Cin, 128) * c_isz
    need = (2 * img_bytes + BH * per_row
            + 2 * _round_up(9 * Cin, 8) * CP * c_isz + 2 * 8 * CP * 4)
    vmem_limit = int(min(max(2 * need, 32 * _MIB), cap * 7 // 8))

    # TODO(synk): for very large decoder images on v7x, switch the resident
    # whole-image input block to overlapping (BH+2)-row halo bands via manual
    # make_async_copy so input VMEM scales with BH instead of H.
    return pl.pallas_call(
        _upsample_conv3x3_kernel,
        out_shape=jax.ShapeDtypeStruct((N, H * W, CP), out_dtype),
        grid_spec=pltpu.PrefetchScalarGridSpec(
            num_scalar_prefetch=0,
            grid=(N, n_bands),
            in_specs=[
                # Whole padded image: block index is constant along the band
                # axis, so it is DMA'd once per image and stays VMEM-resident.
                pl.BlockSpec((1, H + 2, W + 2, Cin), lambda n, b: (n, 0, 0, 0)),
                pl.BlockSpec((9 * Cin, CP), lambda n, b: (0, 0)),
                pl.BlockSpec((1, CP), lambda n, b: (0, 0)),
            ],
            out_specs=pl.BlockSpec((1, BH * W, CP), lambda n, b: (n, b, 0)),
        ),
        compiler_params=pltpu.CompilerParams(
            dimension_semantics=("parallel", "parallel"),
            vmem_limit_bytes=vmem_limit,
        ),
    )(x_pad, w_fold, bias4)


@functools.partial(jax.jit, static_argnames=("compute_dtype", "band_rows"))
def upsample_conv(x_nchw, weight_oihw, bias, *, compute_dtype=None, band_rows=None):
    """PyTorch semantics: nn.Upsample(2,'nearest') + nn.Conv2d(k=3,s=1,p=1); NCHW in/out.

    compute_dtype=jnp.bfloat16 runs the MXU in bf16 with f32 accumulation
    (recommended on v6e/v7x); default keeps f32 inputs.
    """
    N, _, H, W = x_nchw.shape
    Cout = weight_oihw.shape[0]
    x_nhwc = jnp.transpose(x_nchw, (0, 2, 3, 1))
    out_flat = _upsample_conv_flat(x_nhwc, weight_oihw, bias, compute_dtype, band_rows)
    cout_pad = out_flat.shape[-1] // 4
    out = out_flat.reshape(N, H, W, 2, 2, cout_pad)[..., :Cout]
    # Single fused parity de-interleave + NHWC->NCHW pass.
    return jnp.transpose(out, (0, 5, 1, 3, 2, 4)).reshape(N, Cout, 2 * H, 2 * W)


@functools.partial(jax.jit, static_argnames=("compute_dtype", "band_rows"))
def upsample_conv_nhwc(x_nhwc, weight_oihw, bias, *, compute_dtype=None, band_rows=None):
    """NHWC-native entry point (avoids the NCHW<->NHWC transposes entirely)."""
    N, H, W, _ = x_nhwc.shape
    Cout = weight_oihw.shape[0]
    out_flat = _upsample_conv_flat(x_nhwc, weight_oihw, bias, compute_dtype, band_rows)
    cout_pad = out_flat.shape[-1] // 4
    out = out_flat.reshape(N, H, W, 2, 2, cout_pad)[..., :Cout]
    return jnp.transpose(out, (0, 1, 3, 2, 4, 5)).reshape(N, 2 * H, 2 * W, Cout)


@functools.partial(jax.jit, static_argnames=("compute_dtype", "band_rows"))
def upsample_conv_packed(x_nhwc, weight_oihw, bias, *, compute_dtype=None, band_rows=None):
    """Parity-packed (N, H*W, 4*Cout_pad) output: lets a downstream conv fold the
    de-interleave into its own input indexing instead of a 2Hx2W HBM pass."""
    return _upsample_conv_flat(x_nhwc, weight_oihw, bias, compute_dtype, band_rows)


if __name__ == "__main__":
    key = jax.random.PRNGKey(0)
    k1, k2, k3 = jax.random.split(key, 3)

    N, Cin, Cout, H, W = 2, 4, 8, 16, 16
    x = jax.random.normal(k1, (N, Cin, H, W), jnp.float32)

    # Same shapes as nn.Conv2d(Cin, Cout, 3, 1, 1) inside the decoder Upsample block.
    fan_in = Cin * 3 * 3
    bound = 1.0 / (fan_in ** 0.5)
    weight = jax.random.uniform(k2, (Cout, Cin, 3, 3), jnp.float32, -bound, bound)
    bias = jax.random.uniform(k3, (Cout,), jnp.float32, -bound, bound)

    out = jax.block_until_ready(upsample_conv(x, weight, bias))
    assert out.shape == (N, Cout, 2 * H, 2 * W)

    # Pure-JAX reference (nearest 2x upsample + 'same' conv, PyTorch semantics).
    x_up_ref = jnp.repeat(jnp.repeat(x, 2, axis=2), 2, axis=3)
    ref = jax.lax.conv_general_dilated(
        x_up_ref, weight, window_strides=(1, 1), padding=((1, 1), (1, 1)),
        dimension_numbers=('NCHW', 'OIHW', 'NCHW'),
        precision=jax.lax.Precision.HIGHEST)
    ref = ref + bias[None, :, None, None]
    # Tolerance covers the TPU MXU's default f32 matmul precision.
    assert jnp.allclose(out, ref, atol=1e-2, rtol=1e-2), \
        float(jnp.max(jnp.abs(out - ref)))

    # bf16 MXU path (recommended on v6e/v7x); f32 accumulation inside the kernel.
    out_bf16 = jax.block_until_ready(
        upsample_conv(x, weight, bias, compute_dtype=jnp.bfloat16))
    assert out_bf16.shape == out.shape
    assert jnp.allclose(out_bf16, ref, atol=1e-1, rtol=1e-1), \
        float(jnp.max(jnp.abs(out_bf16 - ref)))

    print("KERNEL_OK")
</pallas_src>

<mosaic_0001>
module attributes {stable_mosaic.version = 11 : i64} {
  func.func @_upsample_conv3x3_kernel(%arg0: i32, %arg1: i32, %arg2: memref<1x18x18x4xf32, #tpu.memory_space<vmem>>, %arg3: memref<36x128xf32, #tpu.memory_space<vmem>>, %arg4: memref<1x128xf32, #tpu.memory_space<vmem>>, %arg5: memref<1x128x128xf32, #tpu.memory_space<vmem>>) attributes {dimension_semantics = [#tpu.dimension_semantics<parallel>, #tpu.dimension_semantics<parallel>], iteration_bounds = array<i64: 2, 2>, scalar_prefetch = 0 : i64, scratch_operands = 0 : i64, tpu.core_type = #tpu.core_type<tc>, window_params = [{transform_indices = @transform_0, window_bounds = array<i64: 1, 18, 18, 4>}, {pipeline_mode = #tpu.pipeline_mode<synchronous>, transform_indices = @transform_1, window_bounds = array<i64: 36, 128>}, {pipeline_mode = #tpu.pipeline_mode<synchronous>, transform_indices = @transform_2, window_bounds = array<i64: 1, 128>}, {transform_indices = @transform_3, window_bounds = array<i64: 1, 128, 128>}]} {
    %c8_i32 = arith.constant 8 : i32
    %0 = arith.muli %arg1, %c8_i32 : i32
    %1 = tpu.assume_multiple %0, 8 : i32
    %c0_i32 = arith.constant 0 : i32
    %2 = arith.addi %1, %c0_i32 : i32
    %c0 = arith.constant 0 : index
    %3 = arith.index_cast %2 : i32 to index
    %c0_0 = arith.constant 0 : index
    %c0_1 = arith.constant 0 : index
    %4 = vector.load %arg2[%c0, %3, %c0_0, %c0_1] : memref<1x18x18x4xf32, #tpu.memory_space<vmem>>, vector<1x8x16x4xf32>
    %5 = vector.shape_cast %4 : vector<1x8x16x4xf32> to vector<8x16x4xf32>
    %6 = vector.shape_cast %5 : vector<8x16x4xf32> to vector<128x4xf32>
    %c0_i32_2 = arith.constant 0 : i32
    %7 = arith.addi %1, %c0_i32_2 : i32
    %c0_3 = arith.constant 0 : index
    %8 = arith.index_cast %7 : i32 to index
    %c1 = arith.constant 1 : index
    %c0_4 = arith.constant 0 : index
    %9 = vector.load %arg2[%c0_3, %8, %c1, %c0_4] : memref<1x18x18x4xf32, #tpu.memory_space<vmem>>, vector<1x8x16x4xf32>
    %10 = vector.shape_cast %9 : vector<1x8x16x4xf32> to vector<8x16x4xf32>
    %11 = vector.shape_cast %10 : vector<8x16x4xf32> to vector<128x4xf32>
    %c0_i32_5 = arith.constant 0 : i32
    %12 = arith.addi %1, %c0_i32_5 : i32
    %c0_6 = arith.constant 0 : index
    %13 = arith.index_cast %12 : i32 to index
    %c2 = arith.constant 2 : index
    %c0_7 = arith.constant 0 : index
    %14 = vector.load %arg2[%c0_6, %13, %c2, %c0_7] : memref<1x18x18x4xf32, #tpu.memory_space<vmem>>, vector<1x8x16x4xf32>
    %15 = vector.shape_cast %14 : vector<1x8x16x4xf32> to vector<8x16x4xf32>
    %16 = vector.shape_cast %15 : vector<8x16x4xf32> to vector<128x4xf32>
    %c1_i32 = arith.constant 1 : i32
    %17 = arith.addi %1, %c1_i32 : i32
    %c0_8 = arith.constant 0 : index
    %18 = arith.index_cast %17 : i32 to index
    %c0_9 = arith.constant 0 : index
    %c0_10 = arith.constant 0 : index
    %19 = vector.load %arg2[%c0_8, %18, %c0_9, %c0_10] : memref<1x18x18x4xf32, #tpu.memory_space<vmem>>, vector<1x8x16x4xf32>
    %20 = vector.shape_cast %19 : vector<1x8x16x4xf32> to vector<8x16x4xf32>
    %21 = vector.shape_cast %20 : vector<8x16x4xf32> to vector<128x4xf32>
    %c1_i32_11 = arith.constant 1 : i32
    %22 = arith.addi %1, %c1_i32_11 : i32
    %c0_12 = arith.constant 0 : index
    %23 = arith.index_cast %22 : i32 to index
    %c1_13 = arith.constant 1 : index
    %c0_14 = arith.constant 0 : index
    %24 = vector.load %arg2[%c0_12, %23, %c1_13, %c0_14] : memref<1x18x18x4xf32, #tpu.memory_space<vmem>>, vector<1x8x16x4xf32>
    %25 = vector.shape_cast %24 : vector<1x8x16x4xf32> to vector<8x16x4xf32>
    %26 = vector.shape_cast %25 : vector<8x16x4xf32> to vector<128x4xf32>
    %c1_i32_15 = arith.constant 1 : i32
    %27 = arith.addi %1, %c1_i32_15 : i32
    %c0_16 = arith.constant 0 : index
    %28 = arith.index_cast %27 : i32 to index
    %c2_17 = arith.constant 2 : index
    %c0_18 = arith.constant 0 : index
    %29 = vector.load %arg2[%c0_16, %28, %c2_17, %c0_18] : memref<1x18x18x4xf32, #tpu.memory_space<vmem>>, vector<1x8x16x4xf32>
    %30 = vector.shape_cast %29 : vector<1x8x16x4xf32> to vector<8x16x4xf32>
    %31 = vector.shape_cast %30 : vector<8x16x4xf32> to vector<128x4xf32>
    %c2_i32 = arith.constant 2 : i32
    %32 = arith.addi %1, %c2_i32 : i32
    %c0_19 = arith.constant 0 : index
    %33 = arith.index_cast %32 : i32 to index
    %c0_20 = arith.constant 0 : index
    %c0_21 = arith.constant 0 : index
    %34 = vector.load %arg2[%c0_19, %33, %c0_20, %c0_21] : memref<1x18x18x4xf32, #tpu.memory_space<vmem>>, vector<1x8x16x4xf32>
    %35 = vector.shape_cast %34 : vector<1x8x16x4xf32> to vector<8x16x4xf32>
    %36 = vector.shape_cast %35 : vector<8x16x4xf32> to vector<128x4xf32>
    %c2_i32_22 = arith.constant 2 : i32
    %37 = arith.addi %1, %c2_i32_22 : i32
    %c0_23 = arith.constant 0 : index
    %38 = arith.index_cast %37 : i32 to index
    %c1_24 = arith.constant 1 : index
    %c0_25 = arith.constant 0 : index
    %39 = vector.load %arg2[%c0_23, %38, %c1_24, %c0_25] : memref<1x18x18x4xf32, #tpu.memory_space<vmem>>, vector<1x8x16x4xf32>
    %40 = vector.shape_cast %39 : vector<1x8x16x4xf32> to vector<8x16x4xf32>
    %41 = vector.shape_cast %40 : vector<8x16x4xf32> to vector<128x4xf32>
    %c2_i32_26 = arith.constant 2 : i32
    %42 = arith.addi %1, %c2_i32_26 : i32
    %c0_27 = arith.constant 0 : index
    %43 = arith.index_cast %42 : i32 to index
    %c2_28 = arith.constant 2 : index
    %c0_29 = arith.constant 0 : index
    %44 = vector.load %arg2[%c0_27, %43, %c2_28, %c0_29] : memref<1x18x18x4xf32, #tpu.memory_space<vmem>>, vector<1x8x16x4xf32>
    %45 = vector.shape_cast %44 : vector<1x8x16x4xf32> to vector<8x16x4xf32>
    %46 = vector.shape_cast %45 : vector<8x16x4xf32> to vector<128x4xf32>
    %47 = tpu.concatenate %6, %11, %16, %21, %26, %31, %36, %41, %46 in 1 : vector<128x4xf32>, vector<128x4xf32>, vector<128x4xf32>, vector<128x4xf32>, vector<128x4xf32>, vector<128x4xf32>, vector<128x4xf32>, vector<128x4xf32>, vector<128x4xf32> -> vector<128x36xf32>
    %c0_30 = arith.constant 0 : index
    %c0_31 = arith.constant 0 : index
    %48 = vector.load %arg3[%c0_30, %c0_31] : memref<36x128xf32, #tpu.memory_space<vmem>>, vector<36x128xf32>
    %cst = arith.constant dense<0.000000e+00> : vector<128x128xf32>
    %49 = tpu.matmul %47, %48, %cst {dimension_numbers = #tpu.dot_dimension_numbers<[1], [0], [0], [1], [0, 0, 1, 1], [], []>} : vector<128x36xf32>, vector<36x128xf32>, vector<128x128xf32> -> vector<128x128xf32>
    %c0_32 = arith.constant 0 : index
    %c0_33 = arith.constant 0 : index
    %50 = vector.load %arg4[%c0_32, %c0_33] : memref<1x128xf32, #tpu.memory_space<vmem>>, vector<1x128xf32>
    %51 = vector.broadcast %50 : vector<1x128xf32> to vector<128x128xf32>
    %52 = arith.addf %49, %51 : vector<128x128xf32>
    %c0_34 = arith.constant 0 : index
    %c0_35 = arith.constant 0 : index
    %c0_36 = arith.constant 0 : index
    %53 = vector.load %arg5[%c0_34, %c0_35, %c0_36] : memref<1x128x128xf32, #tpu.memory_space<vmem>>, vector<1x128x128xf32>
    %54 = vector.shape_cast %53 : vector<1x128x128xf32> to vector<128x128xf32>
    %55 = vector.shape_cast %52 : vector<128x128xf32> to vector<1x128x128xf32>
    tpu.vector_store %arg5[%c0_34, %c0_35, %c0_36], %55 {strides = array<i32>} : memref<1x128x128xf32, #tpu.memory_space<vmem>>, vector<1x128x128xf32>,
    return
  }
  func.func @transform_0(%arg0: i32, %arg1: i32) -> (i32, i32, i32, i32) {
    %c0_i32 = arith.constant 0 : i32
    %c0_i32_0 = arith.constant 0 : i32
    %c0_i32_1 = arith.constant 0 : i32
    %c0_i32_2 = arith.constant 0 : i32
    return %arg0, %c0_i32, %c0_i32_0, %c0_i32_1 : i32, i32, i32, i32
  }
  func.func @transform_1(%arg0: i32, %arg1: i32) -> (i32, i32) {
    %c0_i32 = arith.constant 0 : i32
    %c0_i32_0 = arith.constant 0 : i32
    %c0_i32_1 = arith.constant 0 : i32
    return %c0_i32, %c0_i32_0 : i32, i32
  }
  func.func @transform_2(%arg0: i32, %arg1: i32) -> (i32, i32) {
    %c0_i32 = arith.constant 0 : i32
    %c0_i32_0 = arith.constant 0 : i32
    %c0_i32_1 = arith.constant 0 : i32
    return %c0_i32, %c0_i32_0 : i32, i32
  }
  func.func @transform_3(%arg0: i32, %arg1: i32) -> (i32, i32, i32) {
    %c0_i32 = arith.constant 0 : i32
    %c0_i32_0 = arith.constant 0 : i32
    return %arg0, %arg1, %c0_i32 : i32, i32, i32
  }
}

</mosaic_0001>

<bundles_post_ra>
// kernel: tile.8
= control target key start
LH: loop header
LB: loop body
LE: loop exit
PB: predicated region body
PF: predicated region fallthrough
CT: control target
= control target key end

     0   :  { %s22_s0 = inlined_call_operand.vmem [shape: f32[32], index: 0, kind: input, shape index: {}]   ;;  %s23_s1 = inlined_call_operand.vmem [shape: f32[4,32], index: 1, kind: output, shape index: {}]  }
   0x1   :  { %v4_v0 = vld [vmem:[%s22_s0] ss:$0 sm:$0xff] }
   0x2   :  { %5 = vst [vmem:[%s23_s1] sm:$0xf] %v4_v0 }

// kernel: tile.9
= control target key start
LH: loop header
LB: loop body
LE: loop exit
PB: predicated region body
PF: predicated region fallthrough
CT: control target
= control target key end

     0   :  { %vm8_vm0 = vcmask 261120   ;;  %s40_s8 = smov 32   ;;  %s41_s9 = smov 64   ;;  %vm14_vm1 = vcmask 1048320   ;;  %vm20_vm2 = vcmask 785920   ;;  %vm26_vm3 = vcmask 523520   ;;  %s58_s0 = inlined_call_operand.vmem [shape: f32[4,32], index: 0, kind: input, shape index: {}]   ;;  %s59_s1 = inlined_call_operand.vmem [shape: f32[1,128], index: 1, kind: output, shape index: {}]  }
   0x1   :  { %v5_v0 = vld [vmem:[%s58_s0] sm:$0xf]  ;;  %s39_s0 = smov 96  }
   0x2   :  { %6 = vst [vmem:[#allocation1] sm:$0xf] %v5_v0 }
   0x9   :  { %v11_v1 = vld [vmem:[#allocation1 + $0x3] sm:$0x1]   ;;  %v23_v2 = vld [vmem:[#allocation1 + $0x1] sm:$0x1]   ;;  %v7_v3 = vld [vmem:[#allocation1] sm:$0x1]  }
   0xa   :  { %12 = vrot.lane.b32.xlu0 %v11_v1, %s39_s0  ;;  %24 = vrot.lane.b32.xlu1 %v23_v2, %s40_s8  ;;  %v17_v4 = vld [vmem:[#allocation1 + $0x2] sm:$0x1]   ;;  %9 = vst.msk [vmem:[#allocation0] sm:$0x1] %vm8_vm0, %v7_v3  }
   0xe   :  { %18 = vrot.lane.b32.xlu0 %v17_v4, %s41_s9 }
  0x7c   :  { %v13_v5 = vpop.permute.xlu0 %12   ;;  %v25_v6 = vpop.permute.xlu1 %24  }
  0x7d   :  { %15 = vst.msk [vmem:[#allocation0] sm:$0x1] %vm14_vm1, %v13_v5  }
  0x80   :  { %v19_v7 = vpop.permute.xlu0 %18  }
  0x81   :  { %21 = vst.msk [vmem:[#allocation0] sm:$0x1] %vm20_vm2, %v19_v7  }
  0x82   :  { %27 = vst.msk [vmem:[#allocation0] sm:$0x1] %vm26_vm3, %v25_v6  }
  0x89   :  { %v32_v8 = vld [vmem:[#allocation0] sm:$0x1] }
  0x8a   :  { %35 = vst [vmem:[%s59_s1] sm:$0x1] %v32_v8 }

// kernel: upsample_conv.1
= control target key start
LH: loop header
LB: loop body
LE: loop exit
PB: predicated region body
PF: predicated region fallthrough
CT: control target
= control target key end

     0   :  { %s1628_s12 = smov 0   ;;  %s1630_s13 = smov 0   ;;  %s2281_s0 = inlined_call_operand.vmem [shape: f32[2,18,18,4], index: 0, kind: input, shape index: {}]   ;;  %s2282_s1 = inlined_call_operand.vmem [shape: f32[36,128], index: 1, kind: input, shape index: {}]   ;;  %s2283_s2 = inlined_call_operand.vmem [shape: f32[1,128], index: 2, kind: input, shape index: {}]   ;;  %s2284_s3 = inlined_call_operand.vmem [shape: f32[2,256,128], index: 3, kind: output, shape index: {}]  }
   0x1   :  { %s1632_s14 = smov 0   ;;  %s1634_s15 = smov 0  }
   0x2   :  { %s1636_s16 = smov 0  }
   0x3 LB: > { %s22_s17 = sadd.s32 1, %s1590_s14  ;;  %s25_s18 = sadd.s32 1, %s1594_s15  ;;  %s1598_s16 = sphi %s1636_s16, %s13_s16   ;;  %s1594_s15 = sphi %s1634_s15, %s2303_s15   ;;  %s1590_s14 = sphi %s1632_s14, %s2302_s14   ;;  %s1586_s13 = sphi %s1630_s13, %s2301_s13   ;;  %s1582_s12 = sphi %s1628_s12, %s2300_s12  }
   0x4   : > { %p23_p0 = scmp.ge.s32.totalorder %s22_s17, 2  ;;  %p1319_p1 = scmp.ge.s32.totalorder %s1598_s16, 1 }
   0x5   : > { %p151_p2 = scmp.lt.s32.totalorder %s1598_s16, 5 }
   0x6   : > { %s2305_s17 = smov (%p23_p0, %s22_s17), 0  ;;  %s2307_s18 = smov (!%p23_p0, %s25_s18), %s1594_s15 }
   0x7   : > { %p152_p3 = pnand %p1319_p1, %p151_p2  ;;  %p27_p4 = scmp.ge.s32.totalorder %s2307_s18, 2 }
   0x9   : > { %s2309_s18 = smov (%p27_p4, %s2307_s18), 0  ;;  %155 = sbr.rel (%p152_p3) target bundleno = 588 (0x24c), region = 32 }
   0xe   : > { %p179_p5 = scmp.lt.s32.totalorder %s1586_s13, 1  ;;  %s1325_s19 = smul.u32 192, %s1582_s12  ;;  %v999_v26 = vld [vmem:[%s2282_s1 + $0x20] sm:$0xf]  ;;  %vm1056_vm0 = vcmask 1043456   ;;  %v998_v29 = vld [vmem:[%s2282_s1 + $0x18] sm:$0xff] }
   0xf   : > { %s1600_s25 = smov 4   ;;  %s1601_s26 = smov 8   ;;  %1467 = vmatprep.subr.msk.mxu0 %vm1056_vm0, %v999_v26  ;;  %1501 = vmatprep.subr.msk.mxu1 %vm1056_vm0, %v999_v26  ;;  %v997_v30 = vld [vmem:[%s2282_s1 + $0x10] sm:$0xff]  ;;  %v996_v33 = vld [vmem:[%s2282_s1 + $0x8] sm:$0xff]  ;;  %v995_v34 = vld [vmem:[%s2282_s1] sm:$0xff]  ;;  %vm859_vm1 = vcmask 31744  }
  0x10   : > { %s2311_s13 = smov (!%p179_p5, %s1586_s13), 1  ;;  %s1602_s27 = smov 12   ;;  %1468 = vmatpush3.msk.msra.mxu0 %vm1056_vm0, %v999_v26  ;;  %1506 = vmatpush3.msk.msra.mxu1 %vm1056_vm0, %v999_v26  ;;  %vm876_vm2 = vcmask 64512   ;;  %vm893_vm3 = vcmask 97280   ;;  %vm910_vm4 = vcmask 130048   ;;  %vm927_vm5 = vcmask 162816  }
  0x11   : > { %s1511_s20 = smul.u32 432, %s2311_s13  ;;  %s1603_s28 = smov 16   ;;  %1469 = vmatprep.subr.mxu0 %v998_v29  ;;  %1502 = vmatprep.subr.mxu1 %v998_v29  ;;  %vm944_vm6 = vcmask 195584   ;;  %vm961_vm7 = vcmask 228352   ;;  %vm978_vm8 = vcmask 261120   ;;  %vm1007_vm9 = vcmask 293888  }
  0x12   : > { %s1604_s29 = smov 20   ;;  %s1605_s30 = smov 24   ;;  %1470 = vmatpush3.msra.mxu0 %v998_v29  ;;  %1507 = vmatpush3.msra.mxu1 %v998_v29 }
  0x13   : > { %s183_s23 = scalar_lea.vmem %s2281_s0, %s1511_s20  ;;  %s1606_s4 = smov 28   ;;  %1471 = vmatprep.subr.mxu0 %v997_v30  ;;  %1503 = vmatprep.subr.mxu1 %v997_v30 }
  0x14   : > { %s1667_s24 = scalar_lea.vmem %s183_s23, %s1325_s19  ;;  %s1607_s20 = smov 32   ;;  %1472 = vmatpush3.msra.mxu0 %v997_v30  ;;  %1508 = vmatpush3.msra.mxu1 %v997_v30 }
  0x15   : > { %v214_v0 = vld [vmem:[%s1667_s24 + $0x9] sm:$0xff]  ;;  %v213_v1 = vld [vmem:[%s1667_s24 + $0x1] sm:$0xff]  ;;  %v1698_v8 = vld [vmem:[%s1667_s24 + $0x78] sm:$0xff]  ;;  %1473 = vmatprep.subr.mxu0 %v996_v33  ;;  %1504 = vmatprep.subr.mxu1 %v996_v33  ;;  %s1321_s23 = sshll.u32 %s1582_s12, 4 }
  0x16   : > { %365 = vrot.lane.b32.xlu1 %v214_v0, %s1600_s25  ;;  %363 = vrot.lane.b32.xlu0 %v213_v1, %s1600_s25  ;;  %v1674_v2 = vld [vmem:[%s1667_s24 + $0x69] sm:$0xff]  ;;  %v1677_v3 = vld [vmem:[%s1667_s24 + $0x61] sm:$0xff]  ;;  %p187_p6 = scmp.lt.s32.totalorder %s1321_s23, 31 }
  0x17   : > { %v1684_v4 = vld [vmem:[%s1667_s24 + $0x62] sm:$0xff]  ;;  %v1691_v6 = vld [vmem:[%s1667_s24 + $0x6a] sm:$0xff]  ;;  %v1701_v9 = vld [vmem:[%s1667_s24 + $0x18] sm:$0xff]  ;;  %1474 = vmatpush3.msra.mxu0 %v996_v33  ;;  %1509 = vmatpush3.msra.mxu1 %v996_v33 }
  0x18   : > { %v229_v5 = vld [vmem:[%s1667_s24 + $0x2] sm:$0xff]  ;;  %v230_v7 = vld [vmem:[%s1667_s24 + $0xa] sm:$0xff]  ;;  %v1718_v12 = vld [vmem:[%s1667_s24 + $0x79] sm:$0xff]  ;;  %1475 = vmatprep.subr.mxu0 %v995_v34  ;;  %1505 = vmatprep.subr.mxu1 %v995_v34  ;;  %s2313_s23 = smov (!%p187_p6, %s1321_s23), 31 }
  0x19   : > { %v1708_v10 = vld [vmem:[%s1667_s24 + $0x80] sm:$0xff]  ;;  %v1755_v20 = vld [vmem:[%s1667_s24 + $0x90] sm:$0xff]  ;;  %v1772_v22 = vld [vmem:[%s1667_s24 + $0x98] sm:$0xff]  ;;  %1476 = vmatpush3.msra.mxu0 %v995_v34  ;;  %1510 = vmatpush3.msra.mxu1 %v995_v34 }
  0x1a   : > { %381 = vrot.lane.b32.xlu1 %v1674_v2, %s1600_s25  ;;  %379 = vrot.lane.b32.xlu0 %v1677_v3, %s1600_s25  ;;  %v1711_v11 = vld [vmem:[%s1667_s24 + $0x20] sm:$0xff]  ;;  %v1758_v21 = vld [vmem:[%s1667_s24 + $0x30] sm:$0xff] }
  0x1b   : > { %v1344_v13 = vld [vmem:[%s1667_s24 + $0x19] sm:$0xff]  ;;  %v1728_v14 = vld [vmem:[%s1667_s24 + $0x81] sm:$0xff]  ;;  %v1402_v24 = vld [vmem:[%s1667_s24 + $0x91] sm:$0xff] }
  0x1c   : > { %v1345_v15 = vld [vmem:[%s1667_s24 + $0x21] sm:$0xff]  ;;  %v1775_v23 = vld [vmem:[%s1667_s24 + $0x38] sm:$0xff]  ;;  %v1859_v45 = vld [vmem:[%s1667_s24 + $0xb0] sm:$0xff] }
  0x1d   : > { %v1735_v16 = vld [vmem:[%s1667_s24 + $0x7a] sm:$0xff]  ;;  %v1748_v18 = vld [vmem:[%s1667_s24 + $0x82] sm:$0xff]  ;;  %v1394_v25 = vld [vmem:[%s1667_s24 + $0x31] sm:$0xff]  ;;  %2293 = vst [vmem:[#allocation5_spill] sm:$0xff] %v1859_v45 }
  0x1e   : > { %443 = vrot.lane.b32.xlu1 %v1684_v4, %s1601_s26  ;;  %427 = vrot.lane.b32.xlu0 %v229_v5, %s1601_s26  ;;  %v1360_v17 = vld [vmem:[%s1667_s24 + $0x1a] sm:$0xff]  ;;  %2290 = vst [vmem:[#allocation2_spill] sm:$0xff] %v1748_v18  ;;  %v1361_v19 = vld [vmem:[%s1667_s24 + $0x22] sm:$0xff] }
  0x1f   : > { %v1403_v27 = vld [vmem:[%s1667_s24 + $0x99] sm:$0xff]  ;;  %v1831_v37 = vld [vmem:[%s1667_s24 + $0xa8] sm:$0xff]  ;;  %v1862_v46 = vld [vmem:[%s1667_s24 + $0x50] sm:$0xff] }
  0x20   : > { %v1395_v28 = vld [vmem:[%s1667_s24 + $0x39] sm:$0xff]  ;;  %2291 = vst [vmem:[#allocation3_spill] sm:$0xff] %v1831_v37  ;;  %v1834_v38 = vld [vmem:[%s1667_s24 + $0x48] sm:$0xff]  ;;  %2294 = vst [vmem:[#allocation6_spill] sm:$0xff] %v1862_v46 }
  0x21   : > { %v1418_v31 = vld [vmem:[%s1667_s24 + $0x92] sm:$0xff]  ;;  %v1419_v35 = vld [vmem:[%s1667_s24 + $0x9a] sm:$0xff]  ;;  %2292 = vst [vmem:[#allocation4_spill] sm:$0xff] %v1834_v38  ;;  %v1404_v49 = vld [vmem:[%s1667_s24 + $0xa9] sm:$0xff] }
  0x22   : > { %445 = vrot.lane.b32.xlu1 %v1691_v6, %s1601_s26  ;;  %429 = vrot.lane.b32.xlu0 %v230_v7, %s1601_s26  ;;  %v1410_v32 = vld [vmem:[%s1667_s24 + $0x32] sm:$0xff]  ;;  %v1411_v36 = vld [vmem:[%s1667_s24 + $0x3a] sm:$0xff] }
  0x23   : > { %v1396_v50 = vld [vmem:[%s1667_s24 + $0x49] sm:$0xff]  ;;  %v1405_v57 = vld [vmem:[%s1667_s24 + $0xb1] sm:$0xff]  ;;  %v1390_v33 = vld [vmem:[%s1667_s24 + $0xc0] sm:$0xff] }
  0x24   : > { %v1397_v58 = vld [vmem:[%s1667_s24 + $0x51] sm:$0xff] }
  0x25   : > { %v1420_v61 = vld [vmem:[%s1667_s24 + $0xaa] sm:$0xff] }
  0x26   : > { %507 = vrot.lane.b32.xlu1 %v1698_v8, %s1602_s27  ;;  %491 = vrot.lane.b32.xlu0 %v1701_v9, %s1602_s27  ;;  %v1412_v62 = vld [vmem:[%s1667_s24 + $0x4a] sm:$0xff] }
  0x2a   : > { %509 = vrot.lane.b32.xlu1 %v1708_v10, %s1602_s27  ;;  %493 = vrot.lane.b32.xlu0 %v1711_v11, %s1602_s27 }
  0x2e   : > { %571 = vrot.lane.b32.xlu1 %v1718_v12, %s1603_s28  ;;  %555 = vrot.lane.b32.xlu0 %v1344_v13, %s1603_s28 }
  0x32   : > { %383 = vrot.lane.b32.xlu1 %v1718_v12, %s1600_s25  ;;  %367 = vrot.lane.b32.xlu0 %v1344_v13, %s1600_s25 }
  0x36   : > { %573 = vrot.lane.b32.xlu1 %v1728_v14, %s1603_s28  ;;  %557 = vrot.lane.b32.xlu0 %v1345_v15, %s1603_s28 }
  0x3a   : > { %635 = vrot.lane.b32.xlu1 %v1735_v16, %s1604_s29  ;;  %619 = vrot.lane.b32.xlu0 %v1360_v17, %s1604_s29 }
  0x3e   : > { %385 = vrot.lane.b32.xlu1 %v1728_v14, %s1600_s25  ;;  %369 = vrot.lane.b32.xlu0 %v1345_v15, %s1600_s25 }
  0x42   : > { %447 = vrot.lane.b32.xlu1 %v1735_v16, %s1601_s26  ;;  %431 = vrot.lane.b32.xlu0 %v1360_v17, %s1601_s26 }
  0x46   : > { %637 = vrot.lane.b32.xlu1 %v1748_v18, %s1604_s29  ;;  %621 = vrot.lane.b32.xlu0 %v1361_v19, %s1604_s29 }
  0x4a   : > { %699 = vrot.lane.b32.xlu1 %v1755_v20, %s1605_s30  ;;  %683 = vrot.lane.b32.xlu0 %v1758_v21, %s1605_s30 }
  0x4e   : > { %449 = vrot.lane.b32.xlu1 %v1748_v18, %s1601_s26  ;;  %433 = vrot.lane.b32.xlu0 %v1361_v19, %s1601_s26  ;;  %v1421_v19 = vld [vmem:[%s1667_s24 + $0xb2] sm:$0xff] }
  0x52   : > { %511 = vrot.lane.b32.xlu1 %v1755_v20, %s1602_s27  ;;  %495 = vrot.lane.b32.xlu0 %v1758_v21, %s1602_s27 }
  0x56   : > { %701 = vrot.lane.b32.xlu1 %v1772_v22, %s1605_s30  ;;  %685 = vrot.lane.b32.xlu0 %v1775_v23, %s1605_s30 }
  0x5a   : > { %763 = vrot.lane.b32.xlu1 %v1402_v24, %s1606_s4  ;;  %747 = vrot.lane.b32.xlu0 %v1394_v25, %s1606_s4 }
  0x5e   : > { %513 = vrot.lane.b32.xlu1 %v1772_v22, %s1602_s27  ;;  %497 = vrot.lane.b32.xlu0 %v1775_v23, %s1602_s27 }
  0x62   : > { %575 = vrot.lane.b32.xlu1 %v1402_v24, %s1603_s28  ;;  %559 = vrot.lane.b32.xlu0 %v1394_v25, %s1603_s28 }
  0x66   : > { %765 = vrot.lane.b32.xlu1 %v1403_v27, %s1606_s4  ;;  %749 = vrot.lane.b32.xlu0 %v1395_v28, %s1606_s4 }
  0x6a   : > { %827 = vrot.lane.b32.xlu1 %v1418_v31, %s1607_s20  ;;  %811 = vrot.lane.b32.xlu0 %v1410_v32, %s1607_s20 }
  0x6e   : > { %387 = vrot.lane.b32.xlu1 %v1402_v24, %s1600_s25  ;;  %371 = vrot.lane.b32.xlu0 %v1394_v25, %s1600_s25  ;;  %v1413_v24 = vld [vmem:[%s1667_s24 + $0x52] sm:$0xff] }
  0x72   : > { %577 = vrot.lane.b32.xlu1 %v1403_v27, %s1603_s28  ;;  %561 = vrot.lane.b32.xlu0 %v1395_v28, %s1603_s28 }
  0x76   : > { %639 = vrot.lane.b32.xlu1 %v1418_v31, %s1604_s29  ;;  %623 = vrot.lane.b32.xlu0 %v1410_v32, %s1604_s29 }
  0x7a   : > { %829 = vrot.lane.b32.xlu1 %v1419_v35, %s1607_s20  ;;  %813 = vrot.lane.b32.xlu0 %v1411_v36, %s1607_s20 }
  0x7e   : > { %389 = vrot.lane.b32.xlu1 %v1403_v27, %s1600_s25  ;;  %373 = vrot.lane.b32.xlu0 %v1395_v28, %s1600_s25 }
  0x82   : > { %451 = vrot.lane.b32.xlu1 %v1418_v31, %s1601_s26  ;;  %435 = vrot.lane.b32.xlu0 %v1410_v32, %s1601_s26 }
  0x86   : > { %641 = vrot.lane.b32.xlu1 %v1419_v35, %s1604_s29  ;;  %625 = vrot.lane.b32.xlu0 %v1411_v36, %s1604_s29 }
  0x88   : > { %v1836_v39 = vpop.permute.xlu1 %365  ;;  %v1838_v40 = vpop.permute.xlu0 %363 }
  0x8a   : > { %703 = vrot.lane.b32.xlu1 %v1831_v37, %s1605_s30  ;;  %687 = vrot.lane.b32.xlu0 %v1834_v38, %s1605_s30 }
  0x8c   : > { %v1844_v41 = vpop.permute.xlu1 %381  ;;  %v1846_v42 = vpop.permute.xlu0 %379 }
  0x8e   : > { %453 = vrot.lane.b32.xlu1 %v1419_v35, %s1601_s26  ;;  %437 = vrot.lane.b32.xlu0 %v1411_v36, %s1601_s26  ;;  %v205_v36 = vld [vmem:[%s1667_s24 + $0x60] sm:$0xff] }
  0x90   : > { %v1850_v43 = vpop.permute.xlu1 %443  ;;  %v1852_v44 = vpop.permute.xlu0 %427 }
  0x92   : > { %515 = vrot.lane.b32.xlu1 %v1831_v37, %s1602_s27  ;;  %499 = vrot.lane.b32.xlu0 %v1834_v38, %s1602_s27 }
  0x94   : > { %v1864_v47 = vpop.permute.xlu1 %445  ;;  %v1866_v48 = vpop.permute.xlu0 %429 }
  0x96   : > { %705 = vrot.lane.b32.xlu1 %v1859_v45, %s1605_s30  ;;  %689 = vrot.lane.b32.xlu0 %v1862_v46, %s1605_s30 }
  0x98   : > { %v1874_v51 = vpop.permute.xlu1 %507  ;;  %v1876_v52 = vpop.permute.xlu0 %491 }
  0x9a   : > { %767 = vrot.lane.b32.xlu1 %v1404_v49, %s1606_s4  ;;  %751 = vrot.lane.b32.xlu0 %v1396_v50, %s1606_s4 }
  0x9c   : > { %v1880_v53 = vpop.permute.xlu1 %509  ;;  %v1882_v54 = vpop.permute.xlu0 %493 }
  0x9e   : > { %517 = vrot.lane.b32.xlu1 %v1859_v45, %s1602_s27  ;;  %501 = vrot.lane.b32.xlu0 %v1862_v46, %s1602_s27  ;;  %v1391_v45 = vld [vmem:[%s1667_s24 + $0xc8] sm:$0xff] }
  0xa0   : > { %v1888_v55 = vpop.permute.xlu1 %571  ;;  %v1890_v56 = vpop.permute.xlu0 %555 }
  0xa2   : > { %579 = vrot.lane.b32.xlu1 %v1404_v49, %s1603_s28  ;;  %563 = vrot.lane.b32.xlu0 %v1396_v50, %s1603_s28 }
  0xa4   : > { %v384_v59 = vpop.permute.xlu1 %383  ;;  %v368_v60 = vpop.permute.xlu0 %367 }
  0xa6   : > { %769 = vrot.lane.b32.xlu1 %v1405_v57, %s1606_s4  ;;  %753 = vrot.lane.b32.xlu0 %v1397_v58, %s1606_s4 }
  0xa8   : > { %v1900_v63 = vpop.permute.xlu1 %573  ;;  %v1902_v0 = vpop.permute.xlu0 %557 }
  0xaa   : > { %831 = vrot.lane.b32.xlu1 %v1420_v61, %s1607_s20  ;;  %815 = vrot.lane.b32.xlu0 %v1412_v62, %s1607_s20 }
  0xac   : > { %v1906_v1 = vpop.permute.xlu1 %635  ;;  %v1908_v5 = vpop.permute.xlu0 %619 }
  0xae   : > { %391 = vrot.lane.b32.xlu1 %v1404_v49, %s1600_s25  ;;  %375 = vrot.lane.b32.xlu0 %v1396_v50, %s1600_s25 }
  0xb0   : > { %v1912_v7 = vpop.permute.xlu1 %385  ;;  %v1914_v13 = vpop.permute.xlu0 %369 }
  0xb2   : > { %581 = vrot.lane.b32.xlu1 %v1405_v57, %s1603_s28  ;;  %565 = vrot.lane.b32.xlu0 %v1397_v58, %s1603_s28 }
  0xb4   : > { %v448_v15 = vpop.permute.xlu1 %447  ;;  %v432_v17 = vpop.permute.xlu0 %431 }
  0xb6   : > { %643 = vrot.lane.b32.xlu1 %v1420_v61, %s1604_s29  ;;  %627 = vrot.lane.b32.xlu0 %v1412_v62, %s1604_s29 }
  0xb8   : > { %v1922_v25 = vpop.permute.xlu1 %637  ;;  %v1924_v26 = vpop.permute.xlu0 %621 }
  0xba   : > { %833 = vrot.lane.b32.xlu1 %v1421_v19, %s1607_s20  ;;  %817 = vrot.lane.b32.xlu0 %v1413_v24, %s1607_s20 }
  0xbc   : > { %v1928_v27 = vpop.permute.xlu1 %699  ;;  %v1930_v28 = vpop.permute.xlu0 %683 }
  0xbe   : > { %393 = vrot.lane.b32.xlu1 %v1405_v57, %s1600_s25  ;;  %377 = vrot.lane.b32.xlu0 %v1397_v58, %s1600_s25 }
  0xc0   : > { %v1934_v29 = vpop.permute.xlu1 %449  ;;  %v1936_v30 = vpop.permute.xlu0 %433 }
  0xc2   : > { %455 = vrot.lane.b32.xlu1 %v1420_v61, %s1601_s26  ;;  %439 = vrot.lane.b32.xlu0 %v1412_v62, %s1601_s26  ;;  %v870_v61 = vsel %vm859_vm1, %v1698_v8, %v384_v59  ;;  %v862_v62 = vsel %vm859_vm1, %v1701_v9, %v368_v60  ;;  %v206_v9 = vld [vmem:[%s1667_s24 + $0x68] sm:$0xff] }
  0xc3   : > { %v879_v46 = vsel %vm876_vm2, %v862_v62, %v432_v17  ;;  %v868_v17 = vsel %vm859_vm1, %v205_v36, %v1846_v42 }
  0xc4   : > { %v512_v31 = vpop.permute.xlu1 %511  ;;  %v496_v32 = vpop.permute.xlu0 %495 }
  0xc5   : > { %v896_v59 = vsel %vm893_vm3, %v879_v46, %v496_v32  ;;  %v885_v46 = vsel %vm876_vm2, %v868_v17, %v1850_v43 }
  0xc6   : > { %645 = vrot.lane.b32.xlu1 %v1421_v19, %s1604_s29  ;;  %629 = vrot.lane.b32.xlu0 %v1413_v24, %s1604_s29 }
  0xc8   : > { %v1943_v34 = vpop.permute.xlu1 %701  ;;  %v1945_v35 = vpop.permute.xlu0 %685 }
  0xca   : > { %707 = vrot.lane.b32.xlu1 %v1390_v33, %s1605_s30  ;;  %691 = vrot.lane.b32.xlu0 %v205_v36, %s1605_s30 }
  0xcc   : > { %v764_v49 = vpop.permute.xlu1 %763  ;;  %v748_v50 = vpop.permute.xlu0 %747 }
  0xce   : > { %457 = vrot.lane.b32.xlu1 %v1421_v19, %s1601_s26  ;;  %441 = vrot.lane.b32.xlu0 %v1413_v24, %s1601_s26  ;;  %v197_v19 = vld [vmem:[%s1667_s24] sm:$0xff]  ;;  %v887_v24 = vsel %vm876_vm2, %v870_v61, %v448_v15 }
  0xcf   : > { %v904_v38 = vsel %vm893_vm3, %v887_v24, %v512_v31  ;;  %v860_v15 = vsel %vm859_vm1, %v197_v19, %v1838_v40 }
  0xd0   : > { %v1952_v57 = vpop.permute.xlu1 %513  ;;  %v1954_v58 = vpop.permute.xlu0 %497 }
  0xd2   : > { %519 = vrot.lane.b32.xlu1 %v1390_v33, %s1602_s27  ;;  %503 = vrot.lane.b32.xlu0 %v205_v36, %s1602_s27 }
  0xd4   : > { %v576_v37 = vpop.permute.xlu1 %575  ;;  %v560_v18 = vpop.permute.xlu0 %559 }
  0xd5   : > { %v1970_v60 = vsel %vm910_vm4, %v904_v38, %v576_v37  ;;  %v1973_v33 = vsel %vm910_vm4, %v896_v59, %v560_v18  ;;  %v877_v37 = vsel %vm876_vm2, %v860_v15, %v1852_v44  ;;  %v1406_v38 = vld [vmem:[%s1667_s24 + $0xc1] sm:$0xff]  ;;  %v902_v18 = vsel %vm893_vm3, %v885_v46, %v1874_v51  ;;  %v1407_v59 = vld [vmem:[%s1667_s24 + $0xc9] sm:$0xff] }
  0xd6   : > { %709 = vrot.lane.b32.xlu1 %v1391_v45, %s1605_s30  ;;  %693 = vrot.lane.b32.xlu0 %v206_v9, %s1605_s30  ;;  %v894_v40 = vsel %vm893_vm3, %v877_v37, %v1876_v52  ;;  %v919_v32 = vsel %vm910_vm4, %v902_v18, %v1888_v55  ;;  %v1422_v46 = vld [vmem:[%s1667_s24 + $0xc2] sm:$0xff] }
  0xd7   : > { %v911_v43 = vsel %vm910_vm4, %v894_v40, %v1890_v56  ;;  %v936_v44 = vsel %vm927_vm5, %v919_v32, %v1906_v1 }
  0xd8   : > { %v766_v42 = vpop.permute.xlu1 %765  ;;  %v750_v31 = vpop.permute.xlu0 %749  ;;  %v928_v36 = vsel %vm927_vm5, %v911_v43, %v1908_v5  ;;  %v953_v51 = vsel %vm944_vm6, %v936_v44, %v1928_v27 }
  0xd9   : > { %v945_v52 = vsel %vm944_vm6, %v928_v36, %v1930_v28  ;;  %v970_v55 = vsel %vm961_vm7, %v953_v51, %v764_v49  ;;  %v871_v49 = vsel %vm859_vm1, %v1708_v10, %v1912_v7 }
  0xda   : > { %771 = vrot.lane.b32.xlu1 %v1406_v38, %s1606_s4  ;;  %755 = vrot.lane.b32.xlu0 %v1677_v3, %s1606_s4  ;;  %v962_v56 = vsel %vm961_vm7, %v945_v52, %v748_v50  ;;  %v863_v50 = vsel %vm859_vm1, %v1711_v11, %v1914_v13  ;;  %v888_v19 = vsel %vm876_vm2, %v871_v49, %v1934_v29 }
  0xdb   : > { %v880_v24 = vsel %vm876_vm2, %v863_v50, %v1936_v30  ;;  %v905_v7 = vsel %vm893_vm3, %v888_v19, %v1952_v57  ;;  %v869_v30 = vsel %vm859_vm1, %v206_v9, %v1844_v41  ;;  %v1409_v50 = vld [vmem:[%s1667_s24 + $0xe1] sm:$0xff] }
  0xdc   : > { %v828_v1 = vpop.permute.xlu1 %827  ;;  %v812_v61 = vpop.permute.xlu0 %811  ;;  %v897_v11 = vsel %vm893_vm3, %v880_v24, %v1954_v58  ;;  %v886_v57 = vsel %vm876_vm2, %v869_v30, %v1864_v47 }
  0xdd   : > { %v979_v5 = vsel %vm978_vm8, %v962_v56, %v812_v61  ;;  %v987_v62 = vsel %vm978_vm8, %v970_v55, %v828_v1  ;;  %v903_v37 = vsel %vm893_vm3, %v886_v57, %v1880_v53  ;;  %v1393_v56 = vld [vmem:[%s1667_s24 + $0xe0] sm:$0xff] }
  0xde   : > { %521 = vrot.lane.b32.xlu1 %v1391_v45, %s1602_s27  ;;  %505 = vrot.lane.b32.xlu0 %v206_v9, %s1602_s27  ;;  %v198_v45 = vld [vmem:[%s1667_s24 + $0x8] sm:$0xff]  ;;  %v920_v9 = vsel %vm910_vm4, %v903_v37, %v1900_v63 }
  0xdf   : > { %1477 = vmatprep.mubr.msk.f32.mxu0 %vm1007_vm9, %v979_v5  ;;  %1489 = vmatprep.mubr.msk.f32.mxu1 %vm1007_vm9, %v987_v62  ;;  %v861_v29 = vsel %vm859_vm1, %v198_v45, %v1836_v39 }
  0xe0   : > { %v388_v27 = vpop.permute.xlu1 %387  ;;  %v372_v28 = vpop.permute.xlu0 %371  ;;  %v878_v58 = vsel %vm876_vm2, %v861_v29, %v1866_v48  ;;  %v937_v48 = vsel %vm927_vm5, %v920_v9, %v1922_v25  ;;  %v2295_v29 = vld [vmem:[#allocation2_spill] sm:$0xff] }
  0xe1   : > { %v895_v39 = vsel %vm893_vm3, %v878_v58, %v1882_v54  ;;  %v954_v53 = vsel %vm944_vm6, %v937_v48, %v1943_v34  ;;  %v864_v43 = vsel %vm859_vm1, %v1758_v21, %v372_v28 }
  0xe2   : > { %583 = vrot.lane.b32.xlu1 %v1406_v38, %s1603_s28  ;;  %567 = vrot.lane.b32.xlu0 %v1677_v3, %s1603_s28  ;;  %v912_v47 = vsel %vm910_vm4, %v895_v39, %v1902_v0  ;;  %v971_v63 = vsel %vm961_vm7, %v954_v53, %v766_v42  ;;  %v1423_v42 = vld [vmem:[%s1667_s24 + $0xca] sm:$0xff] }
  0xe3   : > { %v929_v18 = vsel %vm927_vm5, %v912_v47, %v1924_v26 }
  0xe4   : > { %v578_v13 = vpop.permute.xlu1 %577  ;;  %v562_v15 = vpop.permute.xlu0 %561  ;;  %v946_v54 = vsel %vm944_vm6, %v929_v18, %v1945_v35 }
  0xe5   : > { %v2033_v17 = vsel %vm910_vm4, %v905_v7, %v578_v13  ;;  %v2036_v3 = vsel %vm910_vm4, %v897_v11, %v562_v15  ;;  %v963_v0 = vsel %vm961_vm7, %v946_v54, %v750_v31  ;;  %v872_v31 = vsel %vm859_vm1, %v1755_v20, %v388_v27  ;;  %v1392_v20 = vld [vmem:[%s1667_s24 + $0xd8] sm:$0xff]  ;;  %v1425_v7 = vld [vmem:[%s1667_s24 + $0xe2] sm:$0xff] }
  0xe6   : > { %773 = vrot.lane.b32.xlu1 %v1407_v59, %s1606_s4  ;;  %757 = vrot.lane.b32.xlu0 %v1674_v2, %s1606_s4 }
  0xe8   : > { %v2054_v38 = vpop.permute.xlu1 %639  ;;  %v2056_v41 = vpop.permute.xlu0 %623 }
  0xe9   : > { %v938_v37 = vsel %vm927_vm5, %v1970_v60, %v2054_v38  ;;  %v930_v39 = vsel %vm927_vm5, %v1973_v33, %v2056_v41 }
  0xea   : > { %835 = vrot.lane.b32.xlu1 %v1422_v46, %s1607_s20  ;;  %819 = vrot.lane.b32.xlu0 %v1684_v4, %s1607_s20 }
  0xec   : > { %v830_v25 = vpop.permute.xlu1 %829  ;;  %v814_v40 = vpop.permute.xlu0 %813 }
  0xed   : > { %v988_v26 = vsel %vm978_vm8, %v971_v63, %v830_v25  ;;  %v980_v32 = vsel %vm978_vm8, %v963_v0, %v814_v40 }
  0xee   : > { %585 = vrot.lane.b32.xlu1 %v1407_v59, %s1603_s28  ;;  %569 = vrot.lane.b32.xlu0 %v1674_v2, %s1603_s28 }
  0xef   : > { %1478 = vmatmul.mubr.msk.f32.vlgmr.msra.gmra.mxu0 %vm1007_vm9, %v980_v32  ;;  %1490 = vmatmul.mubr.msk.f32.vlgmr.msra.gmra.mxu1 %vm1007_vm9, %v988_v26 }
  0xf0   : > { %v390_v34 = vpop.permute.xlu1 %389  ;;  %v374_v35 = vpop.permute.xlu0 %373 }
  0xf1   : > { %v873_v1 = vsel %vm859_vm1, %v1772_v22, %v390_v34  ;;  %v865_v61 = vsel %vm859_vm1, %v1775_v23, %v374_v35 }
  0xf2   : > { %647 = vrot.lane.b32.xlu1 %v1422_v46, %s1604_s29  ;;  %631 = vrot.lane.b32.xlu0 %v1684_v4, %s1604_s29 }
  0xf4   : > { %v452_v2 = vpop.permute.xlu1 %451  ;;  %v436_v44 = vpop.permute.xlu0 %435 }
  0xf5   : > { %v889_v36 = vsel %vm876_vm2, %v872_v31, %v452_v2  ;;  %v881_v51 = vsel %vm876_vm2, %v864_v43, %v436_v44 }
  0xf6   : > { %837 = vrot.lane.b32.xlu1 %v1423_v42, %s1607_s20  ;;  %821 = vrot.lane.b32.xlu0 %v1691_v6, %s1607_s20 }
  0xf8   : > { %v2095_v4 = vpop.permute.xlu1 %641  ;;  %v2097_v52 = vpop.permute.xlu0 %625 }
  0xf9   : > { %v939_v34 = vsel %vm927_vm5, %v2033_v17, %v2095_v4  ;;  %v931_v35 = vsel %vm927_vm5, %v2036_v3, %v2097_v52  ;;  %v2296_v4 = vld [vmem:[#allocation3_spill] sm:$0xff] }
  0xfa   : > { %649 = vrot.lane.b32.xlu1 %v1423_v42, %s1604_s29  ;;  %633 = vrot.lane.b32.xlu0 %v1691_v6, %s1604_s29 }
  0xfc   : > { %v704_v21 = vpop.permute.xlu1 %703  ;;  %v688_v55 = vpop.permute.xlu0 %687 }
  0xfd   : > { %v955_v9 = vsel %vm944_vm6, %v938_v37, %v704_v21  ;;  %v947_v47 = vsel %vm944_vm6, %v930_v39, %v688_v55  ;;  %v2297_v21 = vld [vmem:[#allocation4_spill] sm:$0xff] }
  0xfe   : > { %711 = vrot.lane.b32.xlu1 %v1392_v20, %s1605_s30  ;;  %695 = vrot.lane.b32.xlu0 %v1698_v8, %s1605_s30  ;;  %v1408_v8 = vld [vmem:[%s1667_s24 + $0xd9] sm:$0xff] }
 0x100   : > { %v454_v5 = vpop.permute.xlu1 %453  ;;  %v438_v62 = vpop.permute.xlu0 %437 }
 0x101   : > { %v890_v6 = vsel %vm876_vm2, %v873_v1, %v454_v5  ;;  %v882_v27 = vsel %vm876_vm2, %v865_v61, %v438_v62 }
 0x102   : > { %713 = vrot.lane.b32.xlu1 %v1393_v56, %s1605_s30  ;;  %697 = vrot.lane.b32.xlu0 %v1708_v10, %s1605_s30  ;;  %v1424_v10 = vld [vmem:[%s1667_s24 + $0xda] sm:$0xff]  ;;  %s1322_s24 = sshll.u32 %s2311_s13, 5 }
 0x103   : > { %s190_s25 = sadd.s32 %s1322_s24, %s2313_s23 }
 0x104   : > { %v516_v28 = vpop.permute.xlu1 %515  ;;  %v500_v49 = vpop.permute.xlu0 %499  ;;  %s1323_s26 = sshll.u32 %s190_s25, 3 }
 0x105   : > { %v906_v22 = vsel %vm893_vm3, %v889_v36, %v516_v28  ;;  %v898_v23 = vsel %vm893_vm3, %v881_v51, %v500_v49 }
 0x106   : > { %775 = vrot.lane.b32.xlu1 %v1408_v8, %s1606_s4  ;;  %759 = vrot.lane.b32.xlu0 %v1718_v12, %s1606_s4 }
 0x108   : > { %v706_v45 = vpop.permute.xlu1 %705  ;;  %v690_v19 = vpop.permute.xlu0 %689 }
 0x109   : > { %v956_v42 = vsel %vm944_vm6, %v939_v34, %v706_v45  ;;  %v948_v31 = vsel %vm944_vm6, %v931_v35, %v690_v19 }
 0x10a   : > { %777 = vrot.lane.b32.xlu1 %v1409_v50, %s1606_s4  ;;  %761 = vrot.lane.b32.xlu0 %v1728_v14, %s1606_s4  ;;  %s2248_s4 = scalar_lea.vmem %s2284_s3, %s1323_s26 }
 0x10c   : > { %v768_v24 = vpop.permute.xlu1 %767  ;;  %v752_v59 = vpop.permute.xlu0 %751 }
 0x10d   : > { %v972_v48 = vsel %vm961_vm7, %v955_v9, %v768_v24  ;;  %v964_v18 = vsel %vm961_vm7, %v947_v47, %v752_v59 }
 0x10e   : > { %839 = vrot.lane.b32.xlu1 %v1424_v10, %s1607_s20  ;;  %823 = vrot.lane.b32.xlu0 %v1735_v16, %s1607_s20 }
 0x110   : > { %v518_v11 = vpop.permute.xlu1 %517  ;;  %v502_v13 = vpop.permute.xlu0 %501 }
 0x111   : > { %v907_v12 = vsel %vm893_vm3, %v890_v6, %v518_v11  ;;  %v899_v15 = vsel %vm893_vm3, %v882_v27, %v502_v13 }
 0x112   : > { %841 = vrot.lane.b32.xlu1 %v1425_v7, %s1607_s20  ;;  %825 = vrot.lane.b32.xlu0 %v2295_v29, %s1607_s20 }
 0x114   : > { %v580_v14 = vpop.permute.xlu1 %579  ;;  %v564_v30 = vpop.permute.xlu0 %563 }
 0x115   : > { %v2137_v57 = vsel %vm910_vm4, %v906_v22, %v580_v14  ;;  %v2140_v58 = vsel %vm910_vm4, %v898_v23, %v564_v30 }
 0x118   : > { %v770_v16 = vpop.permute.xlu1 %769  ;;  %v754_v46 = vpop.permute.xlu0 %753 }
 0x119   : > { %v973_v43 = vsel %vm961_vm7, %v956_v42, %v770_v16  ;;  %v965_v2 = vsel %vm961_vm7, %v948_v31, %v754_v46 }
 0x11c   : > { %v832_v53 = vpop.permute.xlu1 %831  ;;  %v816_v54 = vpop.permute.xlu0 %815 }
 0x11d   : > { %v989_v63 = vsel %vm978_vm8, %v972_v48, %v832_v53  ;;  %v981_v0 = vsel %vm978_vm8, %v964_v18, %v816_v54 }
 0x11e   : > { %1480 = vmatprep.mubr.msk.f32.mxu0 %vm1007_vm9, %v981_v0  ;;  %1492 = vmatprep.mubr.msk.f32.mxu1 %vm1007_vm9, %v989_v63 }
 0x120   : > { %v392_v60 = vpop.permute.xlu1 %391  ;;  %v376_v33 = vpop.permute.xlu0 %375 }
 0x121   : > { %v874_v52 = vsel %vm859_vm1, %v2296_v4, %v392_v60  ;;  %v866_v55 = vsel %vm859_vm1, %v2297_v21, %v376_v33  ;;  %v2298_v21 = vld [vmem:[#allocation5_spill] sm:$0xff] }
 0x124   : > { %v582_v38 = vpop.permute.xlu1 %581  ;;  %v566_v41 = vpop.permute.xlu0 %565 }
 0x125   : > { %v924_v25 = vsel %vm910_vm4, %v907_v12, %v582_v38  ;;  %v916_v40 = vsel %vm910_vm4, %v899_v15, %v566_v41 }
 0x128   : > { %v644_v26 = vpop.permute.xlu1 %643  ;;  %v628_v32 = vpop.permute.xlu0 %627 }
 0x129   : > { %v940_v15 = vsel %vm927_vm5, %v2137_v57, %v644_v26  ;;  %v932_v29 = vsel %vm927_vm5, %v2140_v58, %v628_v32 }
 0x12c   : > { %v834_v44 = vpop.permute.xlu1 %833  ;;  %v818_v36 = vpop.permute.xlu0 %817 }
 0x12d   : > { %v990_v51 = vsel %vm978_vm8, %v973_v43, %v834_v44  ;;  %v982_v20 = vsel %vm978_vm8, %v965_v2, %v818_v36 }
 0x12e   : > { %1481 = vmatmul.mubr.msk.f32.gmra.mxu0 %vm1007_vm9, %v982_v20  ;;  %1493 = vmatmul.mubr.msk.f32.gmra.mxu1 %vm1007_vm9, %v990_v51 }
 0x130   : > { %v2172_v17 = vpop.permute.xlu1 %393  ;;  %v2174_v3 = vpop.permute.xlu0 %377 }
 0x134   : > { %v456_v56 = vpop.permute.xlu1 %455  ;;  %v440_v1 = vpop.permute.xlu0 %439 }
 0x135   : > { %v891_v61 = vsel %vm876_vm2, %v874_v52, %v456_v56  ;;  %v883_v5 = vsel %vm876_vm2, %v866_v55, %v440_v1  ;;  %v875_v55 = vsel %vm859_vm1, %v2298_v21, %v2172_v17  ;;  %v2299_v56 = vld [vmem:[#allocation6_spill] sm:$0xff] }
 0x136   : > { %v867_v1 = vsel %vm859_vm1, %v2299_v56, %v2174_v3 }
 0x138   : > { %v646_v62 = vpop.permute.xlu1 %645  ;;  %v630_v6 = vpop.permute.xlu0 %629 }
 0x139   : > { %v941_v53 = vsel %vm927_vm5, %v924_v25, %v646_v62  ;;  %v933_v54 = vsel %vm927_vm5, %v916_v40, %v630_v6 }
 0x13c   : > { %v708_v27 = vpop.permute.xlu1 %707  ;;  %v692_v8 = vpop.permute.xlu0 %691 }
 0x13d   : > { %v957_v14 = vsel %vm944_vm6, %v940_v15, %v708_v27  ;;  %v949_v30 = vsel %vm944_vm6, %v932_v29, %v692_v8 }
 0x140   : > { %v458_v28 = vpop.permute.xlu1 %457  ;;  %v442_v49 = vpop.permute.xlu0 %441 }
 0x141   : > { %v884_v6 = vsel %vm876_vm2, %v867_v1, %v442_v49 }
 0x144   : > { %v520_v22 = vpop.permute.xlu1 %519  ;;  %v504_v23 = vpop.permute.xlu0 %503 }
 0x145   : > { %v908_v44 = vsel %vm893_vm3, %v891_v61, %v520_v22  ;;  %v900_v36 = vsel %vm893_vm3, %v883_v5, %v504_v23  ;;  %v892_v5 = vsel %vm876_vm2, %v875_v55, %v458_v28 }
 0x148   : > { %v710_v50 = vpop.permute.xlu1 %709  ;;  %v694_v45 = vpop.permute.xlu0 %693 }
 0x149   : > { %v958_v63 = vsel %vm944_vm6, %v941_v53, %v710_v50  ;;  %v950_v0 = vsel %vm944_vm6, %v933_v54, %v694_v45 }
 0x14c   : > { %v772_v19 = vpop.permute.xlu1 %771  ;;  %v756_v10 = vpop.permute.xlu0 %755 }
 0x14d   : > { %v974_v16 = vsel %vm961_vm7, %v957_v14, %v772_v19  ;;  %v966_v46 = vsel %vm961_vm7, %v949_v30, %v756_v10 }
 0x150   : > { %v522_v24 = vpop.permute.xlu1 %521  ;;  %v506_v59 = vpop.permute.xlu0 %505 }
 0x151   : > { %v909_v22 = vsel %vm893_vm3, %v892_v5, %v522_v24  ;;  %v901_v17 = vsel %vm893_vm3, %v884_v6, %v506_v59 }
 0x154   : > { %v584_v7 = vpop.permute.xlu1 %583  ;;  %v568_v11 = vpop.permute.xlu0 %567 }
 0x155   : > { %v925_v4 = vsel %vm910_vm4, %v908_v44, %v584_v7  ;;  %v917_v52 = vsel %vm910_vm4, %v900_v36, %v568_v11 }
 0x158   : > { %v774_v13 = vpop.permute.xlu1 %773  ;;  %v758_v12 = vpop.permute.xlu0 %757 }
 0x159   : > { %v975_v60 = vsel %vm961_vm7, %v958_v63, %v774_v13  ;;  %v967_v33 = vsel %vm961_vm7, %v950_v0, %v758_v12 }
 0x15c   : > { %v836_v37 = vpop.permute.xlu1 %835  ;;  %v820_v39 = vpop.permute.xlu0 %819 }
 0x15d   : > { %v991_v9 = vsel %vm978_vm8, %v974_v16, %v836_v37  ;;  %v983_v47 = vsel %vm978_vm8, %v966_v46, %v820_v39  ;;  %v1426_v16 = vld [vmem:[%s2283_s2] ss:$0 sm:$0xff] }
 0x15e   : > { %1483 = vmatprep.mubr.msk.f32.mxu0 %vm1007_vm9, %v983_v47  ;;  %1495 = vmatprep.mubr.msk.f32.mxu1 %vm1007_vm9, %v991_v9 }
 0x160   : > { %v586_v57 = vpop.permute.xlu1 %585  ;;  %v570_v58 = vpop.permute.xlu0 %569 }
 0x161   : > { %v926_v19 = vsel %vm910_vm4, %v909_v22, %v586_v57  ;;  %v918_v28 = vsel %vm910_vm4, %v901_v17, %v570_v58 }
 0x164   : > { %v648_v48 = vpop.permute.xlu1 %647  ;;  %v632_v18 = vpop.permute.xlu0 %631 }
 0x165   : > { %v942_v62 = vsel %vm927_vm5, %v925_v4, %v648_v48  ;;  %v934_v61 = vsel %vm927_vm5, %v917_v52, %v632_v18 }
 0x168   : > { %v838_v38 = vpop.permute.xlu1 %837  ;;  %v822_v41 = vpop.permute.xlu0 %821 }
 0x169   : > { %v992_v26 = vsel %vm978_vm8, %v975_v60, %v838_v38  ;;  %v984_v32 = vsel %vm978_vm8, %v967_v33, %v822_v41 }
 0x16a   : > { %1484 = vmatmul.mubr.msk.f32.gmra.mxu0 %vm1007_vm9, %v984_v32  ;;  %1496 = vmatmul.mubr.msk.f32.gmra.mxu1 %vm1007_vm9, %v992_v26 }
 0x16c   : > { %v650_v25 = vpop.permute.xlu1 %649  ;;  %v634_v40 = vpop.permute.xlu0 %633 }
 0x16d   : > { %v943_v7 = vsel %vm927_vm5, %v926_v19, %v650_v25  ;;  %v935_v24 = vsel %vm927_vm5, %v918_v28, %v634_v40 }
 0x170   : > { %v712_v34 = vpop.permute.xlu1 %711  ;;  %v696_v35 = vpop.permute.xlu0 %695 }
 0x171   : > { %v959_v27 = vsel %vm944_vm6, %v942_v62, %v712_v34  ;;  %v951_v8 = vsel %vm944_vm6, %v934_v61, %v696_v35 }
 0x174   : > { %v714_v42 = vpop.permute.xlu1 %713  ;;  %v698_v31 = vpop.permute.xlu0 %697 }
 0x175   : > { %v960_v59 = vsel %vm944_vm6, %v943_v7, %v714_v42  ;;  %v952_v11 = vsel %vm944_vm6, %v935_v24, %v698_v31 }
 0x178   : > { %v776_v43 = vpop.permute.xlu1 %775  ;;  %v760_v2 = vpop.permute.xlu0 %759 }
 0x179   : > { %v976_v23 = vsel %vm961_vm7, %v959_v27, %v776_v43  ;;  %v968_v3 = vsel %vm961_vm7, %v951_v8, %v760_v2 }
 0x17c   : > { %v778_v51 = vpop.permute.xlu1 %777  ;;  %v762_v20 = vpop.permute.xlu0 %761 }
 0x17d   : > { %v977_v13 = vsel %vm961_vm7, %v960_v59, %v778_v51  ;;  %v969_v12 = vsel %vm961_vm7, %v952_v11, %v762_v20 }
 0x180   : > { %v840_v50 = vpop.permute.xlu1 %839  ;;  %v824_v45 = vpop.permute.xlu0 %823 }
 0x181   : > { %v993_v49 = vsel %vm978_vm8, %v976_v23, %v840_v50  ;;  %v985_v10 = vsel %vm978_vm8, %v968_v3, %v824_v45 }
 0x182   : > { %1486 = vmatprep.mubr.msk.f32.mxu0 %vm1007_vm9, %v985_v10  ;;  %1498 = vmatprep.mubr.msk.f32.mxu1 %vm1007_vm9, %v993_v49 }
 0x184   : > { %v842_v15 = vpop.permute.xlu1 %841  ;;  %v826_v29 = vpop.permute.xlu0 %825 }
 0x185   : > { %v994_v14 = vsel %vm978_vm8, %v977_v13, %v842_v15  ;;  %v986_v30 = vsel %vm978_vm8, %v969_v12, %v826_v29 }
 0x186   : > { %1487 = vmatmul.mubr.msk.f32.gmra.mxu0 %vm1007_vm9, %v986_v30  ;;  %1499 = vmatmul.mubr.msk.f32.gmra.mxu1 %vm1007_vm9, %v994_v14 }
 0x1af   : > { %v1479_v46 = vpop.f32.mrf.mxu0  ;;  %v1491_v37 = vpop.f32.mrf.mxu1 }
 0x1b0   : > { %v1132_v39 = vadd.f32 %v1479_v46, %v1426_v16  ;;  %v1172_v9 = vadd.f32 %v1491_v37, %v1426_v16 }
 0x1b1   : > { %v1126_v47 = vpop.f32.mrf.mxu0  ;;  %v1166_v57 = vpop.f32.mrf.mxu1 }
 0x1b2   : > { %1206 = vst [vmem:[%s2248_s4 + $0x8] sm:$0xff] %v1132_v39  ;;  %1214 = vst [vmem:[%s2248_s4 + $0x48] sm:$0xff] %v1172_v9  ;;  %v1127_v58 = vadd.f32 %v1426_v16, %v1126_v47  ;;  %v1167_v48 = vadd.f32 %v1426_v16, %v1166_v57 }
 0x1b4   : > { %1205 = vst [vmem:[%s2248_s4] sm:$0xff] %v1127_v58  ;;  %1213 = vst [vmem:[%s2248_s4 + $0x40] sm:$0xff] %v1167_v48 }
 0x1ee   : > { %v1482_v18 = vpop.f32.mrf.mxu0  ;;  %v1494_v53 = vpop.f32.mrf.mxu1 }
 0x1ef   : > { %v1142_v54 = vadd.f32 %v1482_v18, %v1426_v16  ;;  %v1182_v63 = vadd.f32 %v1494_v53, %v1426_v16 }
 0x1f0   : > { %v1136_v0 = vpop.f32.mrf.mxu0  ;;  %v1176_v60 = vpop.f32.mrf.mxu1 }
 0x1f1   : > { %1208 = vst [vmem:[%s2248_s4 + $0x18] sm:$0xff] %v1142_v54  ;;  %1216 = vst [vmem:[%s2248_s4 + $0x58] sm:$0xff] %v1182_v63  ;;  %v1137_v33 = vadd.f32 %v1426_v16, %v1136_v0  ;;  %v1177_v38 = vadd.f32 %v1426_v16, %v1176_v60 }
 0x1f3   : > { %1207 = vst [vmem:[%s2248_s4 + $0x10] sm:$0xff] %v1137_v33  ;;  %1215 = vst [vmem:[%s2248_s4 + $0x50] sm:$0xff] %v1177_v38 }
 0x22a   : > { %v1485_v41 = vpop.f32.mrf.mxu0  ;;  %v1497_v26 = vpop.f32.mrf.mxu1 }
 0x22b   : > { %v1152_v32 = vadd.f32 %v1485_v41, %v1426_v16  ;;  %v1192_v25 = vadd.f32 %v1497_v26, %v1426_v16 }
 0x22c   : > { %v1146_v40 = vpop.f32.mrf.mxu0  ;;  %v1186_v34 = vpop.f32.mrf.mxu1 }
 0x22d   : > { %1210 = vst [vmem:[%s2248_s4 + $0x28] sm:$0xff] %v1152_v32  ;;  %1218 = vst [vmem:[%s2248_s4 + $0x68] sm:$0xff] %v1192_v25  ;;  %v1147_v35 = vadd.f32 %v1426_v16, %v1146_v40  ;;  %v1187_v42 = vadd.f32 %v1426_v16, %v1186_v34 }
 0x22f   : > { %1209 = vst [vmem:[%s2248_s4 + $0x20] sm:$0xff] %v1147_v35  ;;  %1217 = vst [vmem:[%s2248_s4 + $0x60] sm:$0xff] %v1187_v42 }
 0x246   : > { %v1488_v31 = vpop.f32.mrf.mxu0  ;;  %v1500_v43 = vpop.f32.mrf.mxu1 }
 0x247   : > { %v1162_v2 = vadd.f32 %v1488_v31, %v1426_v16  ;;  %v1202_v44 = vadd.f32 %v1500_v43, %v1426_v16 }
 0x248   : > { %v1156_v36 = vpop.f32.mrf.mxu0  ;;  %v1196_v51 = vpop.f32.mrf.mxu1 }
 0x249   : > { %1212 = vst [vmem:[%s2248_s4 + $0x38] sm:$0xff] %v1162_v2  ;;  %1220 = vst [vmem:[%s2248_s4 + $0x78] sm:$0xff] %v1202_v44  ;;  %v1157_v20 = vadd.f32 %v1426_v16, %v1156_v36  ;;  %v1197_v4 = vadd.f32 %v1426_v16, %v1196_v51 }
 0x24b   : > { %1211 = vst [vmem:[%s2248_s4 + $0x30] sm:$0xff] %v1157_v20  ;;  %1219 = vst [vmem:[%s2248_s4 + $0x70] sm:$0xff] %v1197_v4 }
 0x24c PF: > { %s13_s16 = sadd.s32 1, %s1598_s16   ;;  %s2300_s12 = smov %s1590_s14 }
 0x24d   : > { %p10_p7 = scmp.ge.s32.totalorder %s13_s16, 6   ;;  %s2301_s13 = smov %s1594_s15 }
 0x24e   : > { %s2302_s14 = smov %s2305_s17  ;;  %s2303_s15 = smov %s2309_s18 }
 0x24f   :  { %12 = sbr.rel (!%p10_p7) target bundleno = 3 (0x3), region = 65 }

</bundles_post_ra>
